<compile_context>
chip_gen: v7x
topology: tpu7x:2x2x1
jax: 0.10.0
libtpu: 0.0.40
codegen_flags: <defaults>
</compile_context>

<pallas_src>
import jax
import jax.numpy as jnp
from jax.experimental import pallas as pl
from jax.experimental.pallas import tpu as pltpu

jax.config.update("jax_default_matmul_precision", "highest")

# ----- small shapes consistent with the module -------------------------------
B = 2            # batch
C = 32           # channels (must be >= reduction so C // reduction >= 1)
H = 8            # spatial height
W = 16           # spatial width  -> H*W = 128 (one full lane row)
REDUCTION = 16
CR = C // REDUCTION            # 2
HW = H * W                     # 128


# ----------------------------- fused Pallas kernel ---------------------------
def se_kernel(x_ref, w1_ref, w2_ref, o_ref):
    f32 = jnp.float32
    x = x_ref[0]                                              # (C, HW)

    # --- squeeze: global average pool over the spatial (lane) axis -----------
    y = jnp.mean(x, axis=1, keepdims=True)                    # (C, 1)

    # --- excitation: Linear(C -> C/r, bias=False) + ReLU ----------------------
    hid = jnp.maximum(
        jnp.dot(w1_ref[...], y, preferred_element_type=f32), 0.0)      # (CR, 1)

    # --- Linear(C/r -> C, bias=False) + numerically stable sigmoid ------------
    z = jnp.dot(w2_ref[...], hid, preferred_element_type=f32)          # (C, 1)
    ez = jnp.exp(-jnp.abs(z))
    s = jnp.where(z >= 0, 1.0 / (1.0 + ez), ez / (1.0 + ez))           # (C, 1)

    # --- scale: broadcast the per-channel gate across all lanes ---------------
    o_ref[0] = x * s                                          # (C, HW)


# --------------------------------- wrapper -----------------------------------
@jax.jit
def se_block_forward(x_nchw, w1, w2):
    b, c, h, w = x_nchw.shape
    hw = h * w
    # (B, C, H, W) -> (B, C, H*W): merging the two trailing contiguous dims is a
    # free relayout; gives channels-on-sublanes / spatial-on-lanes inside the kernel.
    x2 = x_nchw.reshape(b, c, hw)
    out = pl.pallas_call(
        se_kernel,
        out_shape=jax.ShapeDtypeStruct((b, c, hw), x2.dtype),
        grid=(b,),
        in_specs=[pl.BlockSpec((1, c, hw), lambda i: (i, 0, 0)),
                  pl.BlockSpec((CR, c), lambda i: (0, 0)),
                  pl.BlockSpec((c, CR), lambda i: (0, 0))],
        out_specs=pl.BlockSpec((1, c, hw), lambda i: (i, 0, 0)),
        compiler_params=pltpu.CompilerParams(
            dimension_semantics=("parallel",),     # one batch element per core
            vmem_limit_bytes=32 * 1024 * 1024),
    )(x2, w1, w2)
    return out.reshape(b, c, h, w)


# ------------------- pure-JAX reference (PyTorch semantics) ------------------
def reference_forward(x_nchw, w1, w2):
    b, c, _, _ = x_nchw.shape
    y = x_nchw.mean(axis=(2, 3))                 # AdaptiveAvgPool2d(1).view(b, c)
    y = jnp.maximum(y @ w1.T, 0.0)               # Linear(C, C//r, bias=False) + ReLU
    y = jax.nn.sigmoid(y @ w2.T)                 # Linear(C//r, C, bias=False) + Sigmoid
    return x_nchw * y.reshape(b, c, 1, 1)


# --------------------------------- main ---------------------------------------
if __name__ == "__main__":
    key = jax.random.PRNGKey(0)
    kx, k1, k2 = jax.random.split(key, 3)

    x = jax.random.normal(kx, (B, C, H, W), dtype=jnp.float32)
    # PyTorch Linear weights are (out_features, in_features), bias=False.
    w1 = (0.3 * jax.random.normal(k1, (CR, C))).astype(jnp.float32)   # Linear(C -> C/r)
    w2 = (0.3 * jax.random.normal(k2, (C, CR))).astype(jnp.float32)   # Linear(C/r -> C)

    out = se_block_forward(x, w1, w2)
    out = jax.block_until_ready(out)

    ref = reference_forward(x, w1, w2)
    assert out.shape == (B, C, H, W)
    if not jnp.allclose(out, ref, rtol=1e-5, atol=1e-5):
        max_err = float(jnp.max(jnp.abs(out - ref)))
        raise SystemExit(f"mismatch vs reference, max abs err = {max_err}")
    print("KERNEL_OK")
</pallas_src>

<mosaic_0001>
module attributes {stable_mosaic.version = 11 : i64} {
  func.func @se_kernel(%arg0: i32, %arg1: memref<1x32x128xf32, #tpu.memory_space<vmem>>, %arg2: memref<2x32xf32, #tpu.memory_space<vmem>>, %arg3: memref<32x2xf32, #tpu.memory_space<vmem>>, %arg4: memref<1x32x128xf32, #tpu.memory_space<vmem>>) attributes {dimension_semantics = [#tpu.dimension_semantics<parallel>], iteration_bounds = array<i64: 2>, scalar_prefetch = 0 : i64, scratch_operands = 0 : i64, tpu.core_type = #tpu.core_type<tc>, window_params = [{transform_indices = @transform_0, window_bounds = array<i64: 1, 32, 128>}, {pipeline_mode = #tpu.pipeline_mode<synchronous>, transform_indices = @transform_1, window_bounds = array<i64: 2, 32>}, {pipeline_mode = #tpu.pipeline_mode<synchronous>, transform_indices = @transform_2, window_bounds = array<i64: 32, 2>}, {transform_indices = @transform_3, window_bounds = array<i64: 1, 32, 128>}]} {
    %c0 = arith.constant 0 : index
    %c0_0 = arith.constant 0 : index
    %c0_1 = arith.constant 0 : index
    %0 = vector.load %arg1[%c0, %c0_0, %c0_1] : memref<1x32x128xf32, #tpu.memory_space<vmem>>, vector<1x32x128xf32>
    %1 = vector.shape_cast %0 : vector<1x32x128xf32> to vector<32x128xf32>
    %cst = arith.constant dense<0.000000e+00> : vector<32xf32>
    %2 = vector.multi_reduction <add>, %1, %cst [1] : vector<32x128xf32> to vector<32xf32>
    %3 = vector.shape_cast %2 : vector<32xf32> to vector<32x1xf32>
    %cst_2 = arith.constant 1.280000e+02 : f32
    %4 = vector.broadcast %cst_2 : f32 to vector<32x1xf32>
    %5 = arith.divf %3, %4 : vector<32x1xf32>
    %c0_3 = arith.constant 0 : index
    %c0_4 = arith.constant 0 : index
    %6 = vector.load %arg2[%c0_3, %c0_4] : memref<2x32xf32, #tpu.memory_space<vmem>>, vector<2x32xf32>
    %cst_5 = arith.constant dense<0.000000e+00> : vector<2x1xf32>
    %7 = tpu.matmul %6, %5, %cst_5 {dimension_numbers = #tpu.dot_dimension_numbers<[1], [0], [0], [1], [0, 0, 1, 1], [], []>, precision = #tpu.contract_precision<fp32>} : vector<2x32xf32>, vector<32x1xf32>, vector<2x1xf32> -> vector<2x1xf32>
    %cst_6 = arith.constant 0.000000e+00 : f32
    %8 = vector.broadcast %cst_6 : f32 to vector<2x1xf32>
    %9 = arith.maximumf %7, %8 : vector<2x1xf32>
    %c0_7 = arith.constant 0 : index
    %c0_8 = arith.constant 0 : index
    %10 = vector.load %arg3[%c0_7, %c0_8] : memref<32x2xf32, #tpu.memory_space<vmem>>, vector<32x2xf32>
    %cst_9 = arith.constant dense<0.000000e+00> : vector<32x1xf32>
    %11 = tpu.matmul %10, %9, %cst_9 {dimension_numbers = #tpu.dot_dimension_numbers<[1], [0], [0], [1], [0, 0, 1, 1], [], []>, precision = #tpu.contract_precision<fp32>} : vector<32x2xf32>, vector<2x1xf32>, vector<32x1xf32> -> vector<32x1xf32>
    %12 = math.absf %11 : vector<32x1xf32>
    %cst_10 = arith.constant 0.000000e+00 : f32
    %13 = vector.broadcast %cst_10 : f32 to vector<32x1xf32>
    %14 = arith.subf %13, %12 : vector<32x1xf32>
    %15 = math.exp %14 : vector<32x1xf32>
    %cst_11 = arith.constant 0.000000e+00 : f32
    %16 = vector.broadcast %cst_11 : f32 to vector<32x1xf32>
    %17 = arith.cmpf oge, %11, %16 : vector<32x1xf32>
    %cst_12 = arith.constant 1.000000e+00 : f32
    %18 = vector.broadcast %cst_12 : f32 to vector<32x1xf32>
    %19 = arith.addf %18, %15 : vector<32x1xf32>
    %cst_13 = arith.constant 1.000000e+00 : f32
    %20 = vector.broadcast %cst_13 : f32 to vector<32x1xf32>
    %21 = arith.divf %20, %19 : vector<32x1xf32>
    %cst_14 = arith.constant 1.000000e+00 : f32
    %22 = vector.broadcast %cst_14 : f32 to vector<32x1xf32>
    %23 = arith.addf %22, %15 : vector<32x1xf32>
    %24 = arith.divf %15, %23 : vector<32x1xf32>
    %25 = arith.select %17, %21, %24 : vector<32x1xi1>, vector<32x1xf32>
    %26 = vector.broadcast %25 : vector<32x1xf32> to vector<32x128xf32>
    %27 = arith.mulf %1, %26 : vector<32x128xf32>
    %c0_15 = arith.constant 0 : index
    %c0_16 = arith.constant 0 : index
    %c0_17 = arith.constant 0 : index
    %28 = vector.load %arg4[%c0_15, %c0_16, %c0_17] : memref<1x32x128xf32, #tpu.memory_space<vmem>>, vector<1x32x128xf32>
    %29 = vector.shape_cast %28 : vector<1x32x128xf32> to vector<32x128xf32>
    %30 = vector.shape_cast %27 : vector<32x128xf32> to vector<1x32x128xf32>
    tpu.vector_store %arg4[%c0_15, %c0_16, %c0_17], %30 {strides = array<i32>} : memref<1x32x128xf32, #tpu.memory_space<vmem>>, vector<1x32x128xf32>,
    return
  }
  func.func @transform_0(%arg0: i32) -> (i32, i32, i32) {
    %c0_i32 = arith.constant 0 : i32
    %c0_i32_0 = arith.constant 0 : i32
    %c0_i32_1 = arith.constant 0 : i32
    return %arg0, %c0_i32, %c0_i32_0 : i32, i32, i32
  }
  func.func @transform_1(%arg0: i32) -> (i32, i32) {
    %c0_i32 = arith.constant 0 : i32
    %c0_i32_0 = arith.constant 0 : i32
    %c0_i32_1 = arith.constant 0 : i32
    return %c0_i32, %c0_i32_0 : i32, i32
  }
  func.func @transform_2(%arg0: i32) -> (i32, i32) {
    %c0_i32 = arith.constant 0 : i32
    %c0_i32_0 = arith.constant 0 : i32
    %c0_i32_1 = arith.constant 0 : i32
    return %c0_i32, %c0_i32_0 : i32, i32
  }
  func.func @transform_3(%arg0: i32) -> (i32, i32, i32) {
    %c0_i32 = arith.constant 0 : i32
    %c0_i32_0 = arith.constant 0 : i32
    %c0_i32_1 = arith.constant 0 : i32
    return %arg0, %c0_i32, %c0_i32_0 : i32, i32, i32
  }
}

</mosaic_0001>

<bundles_post_ra>
// kernel: se_block_forward.1
= control target key start
LH: loop header
LB: loop body
LE: loop exit
PB: predicated region body
PF: predicated region fallthrough
CT: control target
= control target key end

     0   :  { %s1713_s12 = smov 0   ;;  %s1804_s0 = inlined_call_operand.vmem [shape: f32[2,32,128], index: 0, kind: input, shape index: {}]   ;;  %s1805_s1 = inlined_call_operand.vmem [shape: f32[2,32], index: 1, kind: input, shape index: {}]   ;;  %s1806_s2 = inlined_call_operand.vmem [shape: f32[32,2], index: 2, kind: input, shape index: {}]   ;;  %s1807_s3 = inlined_call_operand.vmem [shape: f32[2,32,128], index: 3, kind: output, shape index: {}]  }
   0x1 LB: > { %s1398_s13 = sadd.s32 4294967295, %s1687_s12   ;;  %p1402_p0 = scmp.ge.s32.totalorder %s1687_s12, 1  ;;  %s1687_s12 = sphi %s1713_s12, %s13_s12  }
   0x2   : > { %p137_p1 = scmp.lt.s32.totalorder %s1687_s12, 3 }
   0x4   : > { %p138_p2 = pnand %p1402_p0, %p137_p1 }
   0x5   : > { %p161_p3 = scmp.lt.s32.totalorder (!%p138_p2), %s1398_s13, 1  ;;  %v1689_v4 = vmov (!%p138_p2), 0.0|0.0   ;;  %vm1690_vm0 = vmmov (!%p138_p2), 0   ;;  %v1691_v5 = vmov (!%p138_p2), 0.0   ;;  %v188_v6 = vld [vmem:[%s1805_s1] sm:$0x3] (!%p138_p2) }
   0x6   : > { %141 = sbr.rel (%p138_p2) target bundleno = 860 (0x35c), region = 32  ;;  %1585 = vmatprep.subr.bf16.mxu0 (!%p138_p2), %v1689_v4  ;;  %1479 = vmatprep.mubr.msk.f32.mxu0 (!%p138_p2), %vm1690_vm0, %v1691_v5  ;;  %vm189_vm1 = vcmask (!%p138_p2), 261120   ;;  %v679_v49 = vld [vmem:[%s1806_s2] sm:$0xff] (!%p138_p2)  ;;  %vm683_vm2 = vcmask (!%p138_p2), 15360   ;;  %v680_v56 = vld [vmem:[%s1806_s2 + $0x8] sm:$0xff] (!%p138_p2)  ;;  %v681_v57 = vld [vmem:[%s1806_s2 + $0x10] sm:$0xff] (!%p138_p2) }
   0x7   : > { %v191_v7 = vsel (!%p138_p2), %vm189_vm1, %v188_v6, 0  ;;  %v685_v50 = vsel (!%p138_p2), %vm683_vm2, %v679_v49, 0  ;;  %v688_v58 = vsel (!%p138_p2), %vm683_vm2, %v680_v56, 0  ;;  %v691_v59 = vsel (!%p138_p2), %vm683_vm2, %v681_v57, 0  ;;  %v682_v60 = vld [vmem:[%s1806_s2 + $0x18] sm:$0xff] (!%p138_p2) }
   0x8   : > { %v1747_v8 = vand.u32 (!%p138_p2), 4294901760, %v191_v7  ;;  %v1777_v51 = vand.u32 (!%p138_p2), 4294901760, %v685_v50  ;;  %v776_v61 = vand.u32 (!%p138_p2), 4294901760, %v688_v58  ;;  %v786_v62 = vand.u32 (!%p138_p2), 4294901760, %v691_v59 }
   0x9   : > { %v694_v63 = vsel (!%p138_p2), %vm683_vm2, %v682_v60, 0  ;;  %vm696_vm3 = vcmask (!%p138_p2), 1041408  }
   0xa   : > { %v263_v14 = vsub.f32 (!%p138_p2), %v191_v7, %v1747_v8  ;;  %v767_v52 = vsub.f32 (!%p138_p2), %v685_v50, %v1777_v51  ;;  %v787_v6 = vsub.f32 (!%p138_p2), %v691_v59, %v786_v62 }
   0xc   : > { %v264_v23 = vand.u32 (!%p138_p2), 4294901760, %v263_v14  ;;  %v768_v53 = vand.u32 (!%p138_p2), 4294901760, %v767_v52 }
   0xd   : > { %s1809_s13 = smov (!%p161_p3, %s1398_s13), 1 }
   0xe   : > { %s1409_s14 = sshll.u32 %s1809_s13, 5  ;;  %v265_v30 = vsub.f32 %v263_v14, %v264_v23  ;;  %v769_v54 = vsub.f32 %v767_v52, %v768_v53 }
   0xf   : > { %s165_s17 = scalar_lea.vmem %s1804_s0, %s1409_s14  ;;  %s170_s30 = scalar_lea.vmem %s1807_s3, %s1409_s14 }
  0x10   : > { %v1729_v0 = vld [vmem:[%s165_s17 + $0x10] sm:$0xff]  ;;  %v1731_v1 = vld [vmem:[%s165_s17] sm:$0xff]  ;;  %v1735_v2 = vld [vmem:[%s165_s17 + $0x18] sm:$0xff]  ;;  %v266_v37 = vand.u32 4294901760, %v265_v30  ;;  %v770_v55 = vand.u32 4294901760, %v769_v54 }
  0x11   : > { %179 = vadd.xlane.f32.xlu1 %v1729_v0  ;;  %175 = vadd.xlane.f32.xlu0 %v1731_v1  ;;  %v1737_v3 = vld [vmem:[%s165_s17 + $0x8] sm:$0xff] }
  0x12   : > { %1539 = vmatprep.mubr.f32.mxu1 %v770_v55 }
  0x15   : > { %181 = vadd.xlane.f32.xlu1 %v1735_v2  ;;  %177 = vadd.xlane.f32.xlu0 %v1737_v3 }
  0x9e   : > { %v180_v9 = vpop.xlane.xlu1 %179  ;;  %v176_v10 = vpop.xlane.xlu0 %175 }
  0x9f   : > { %v186_v11 = vmul.f32 0.0078125, %v180_v9  ;;  %v184_v12 = vmul.f32 0.0078125, %v176_v10  ;;  %v788_v9 = vand.u32 4294901760, %v787_v6 }
  0xa1   : > { %v194_v13 = vand.u32 4294901760, %v184_v12  ;;  %v200_v15 = vand.u32 4294901760, %v186_v11 }
  0xa2   : > { %v182_v16 = vpop.xlane.xlu1 %181  ;;  %v178_v17 = vpop.xlane.xlu0 %177 }
  0xa3   : > { %v274_v18 = vsub.f32 %v184_v12, %v194_v13  ;;  %v187_v19 = vmul.f32 0.0078125, %v182_v16  ;;  %v185_v20 = vmul.f32 0.0078125, %v178_v17  ;;  %v288_v24 = vsub.f32 %v186_v11, %v200_v15 }
  0xa5   : > { %v203_v21 = vand.u32 4294901760, %v187_v19  ;;  %v197_v22 = vand.u32 4294901760, %v185_v20  ;;  %v275_v25 = vand.u32 4294901760, %v274_v18  ;;  %v289_v31 = vand.u32 4294901760, %v288_v24 }
  0xa7   : > { %v295_v26 = vsub.f32 %v187_v19, %v203_v21  ;;  %v281_v27 = vsub.f32 %v185_v20, %v197_v22  ;;  %v1586_v28 = vpack.c.bf16 %v197_v22, %v194_v13  ;;  %v276_v32 = vsub.f32 %v274_v18, %v275_v25 }
  0xa8   : > { %v1589_v36 = vpack.c.bf16 %v203_v21, %v200_v15  ;;  %v290_v38 = vsub.f32 %v288_v24, %v289_v31  ;;  %v789_v15 = vsub.f32 %v787_v6, %v788_v9 }
  0xa9   : > { %v296_v29 = vand.u32 4294901760, %v295_v26  ;;  %v282_v33 = vand.u32 4294901760, %v281_v27  ;;  %1587 = vmatpush3.bf16.msra.mxu0 %v1586_v28  ;;  %v277_v39 = vand.u32 4294901760, %v276_v32  ;;  %v1598_v45 = vpack.c.bf16 %v281_v27, %v274_v18 }
  0xaa   : > { %1588 = vmatprep.subr.bf16.mxu0 %v1689_v4  ;;  %v291_v43 = vand.u32 4294901760, %v290_v38  ;;  %v1601_v46 = vpack.c.bf16 %v295_v26, %v288_v24  ;;  %v790_v20 = vand.u32 4294901760, %v789_v15 }
  0xab   : > { %v297_v34 = vsub.f32 %v295_v26, %v296_v29  ;;  %v283_v35 = vsub.f32 %v281_v27, %v282_v33  ;;  %v1610_v47 = vpack.c.bf16 %v282_v33, %v275_v25  ;;  %v1613_v48 = vpack.c.bf16 %v296_v29, %v289_v31 }
  0xac   : > { %v1692_v26 = vmov 0  }
  0xad   : > { %v284_v40 = vand.u32 4294901760, %v283_v35  ;;  %1590 = vmatpush3.bf16.msra.mxu0 %v1589_v36  ;;  %v298_v41 = vand.u32 4294901760, %v297_v34  ;;  %1664 = vset.pattern.permute.xlu1 %v1692_v26 }
  0xae   : > { %1591 = vmatprep.subr.bf16.mxu0 %v1689_v4  ;;  %1663 = vset.pattern.permute.xlu0 %v1692_v26 }
  0xaf   : > { %v1592_v42 = vpack.c.bf16 %v284_v40, %v277_v39  ;;  %v1595_v44 = vpack.c.bf16 %v298_v41, %v291_v43 }
  0xb0   : > { %1480 = vmatmul.mubr.f32.vlgmr.msra.gmra.mrb[0].mxu0 %v266_v37 }
  0xb1   : > { %1593 = vmatpush3.bf16.msra.mxu0 %v1592_v42  ;;  %1490 = vmatprep.mubr.msk.f32.mxu0 %vm1690_vm0, %v1691_v5 }
  0xb2   : > { %1594 = vmatprep.subr.bf16.mxu0 %v1689_v4 }
  0xb5   : > { %1596 = vmatpush3.bf16.msra.mxu0 %v1595_v44 }
  0xb6   : > { %1597 = vmatprep.subr.bf16.mxu0 %v1689_v4 }
  0xb8   : > { %1491 = vmatmul.mubr.f32.vlgmr.msra.gmra.mrb[0].mxu0 %v1747_v8 }
  0xb9   : > { %1599 = vmatpush3.bf16.msra.mxu0 %v1598_v45  ;;  %1501 = vmatprep.mubr.msk.f32.mxu0 %vm1690_vm0, %v1691_v5 }
  0xba   : > { %1600 = vmatprep.subr.bf16.mxu0 %v1689_v4 }
  0xbd   : > { %1602 = vmatpush3.bf16.msra.mxu0 %v1601_v46 }
  0xbe   : > { %1603 = vmatprep.subr.bf16.mxu0 %v1689_v4 }
  0xc0   : > { %1502 = vmatmul.mubr.f32.vlgmr.msra.gmra.mrb[0].mxu0 %v263_v14 }
  0xc1   : > { %1605 = vmatpush3.bf16.msra.mxu0 %v1586_v28  ;;  %1512 = vmatprep.mubr.msk.f32.mxu0 %vm1690_vm0, %v1691_v5 }
  0xc2   : > { %1606 = vmatprep.subr.bf16.mxu0 %v1689_v4 }
  0xc5   : > { %1608 = vmatpush3.bf16.msra.mxu0 %v1589_v36 }
  0xc6   : > { %1609 = vmatprep.subr.bf16.mxu0 %v1689_v4 }
  0xc8   : > { %1513 = vmatmul.mubr.f32.vlgmr.msra.gmra.mrb[0].mxu0 %v264_v23 }
  0xc9   : > { %1611 = vmatpush3.bf16.msra.mxu0 %v1610_v47  ;;  %1523 = vmatprep.mubr.msk.f32.mxu0 %vm1690_vm0, %v1691_v5 }
  0xca   : > { %1612 = vmatprep.subr.bf16.mxu0 %v1689_v4 }
  0xcd   : > { %1614 = vmatpush3.bf16.msra.mxu0 %v1613_v48 }
  0xce   : > { %1615 = vmatprep.subr.bf16.mxu0 %v1689_v4 }
  0xd0   : > { %1524 = vmatmul.mubr.f32.vlgmr.msra.gmra.mrb[0].mxu0 %v1747_v8 }
  0xd1   : > { %1617 = vmatpush3.bf16.msra.mxu0 %v1586_v28  ;;  %1534 = vmatprep.mubr.msk.f32.mxu0 %vm1690_vm0, %v1691_v5  ;;  %v796_v5 = vand.u32 4294901760, %v694_v63 }
  0xd2   : > { %1618 = vmatprep.subr.bf16.mxu0 %v1689_v4  ;;  %v777_v4 = vsub.f32 %v688_v58, %v776_v61 }
  0xd4   : > { %v778_v7 = vand.u32 4294901760, %v777_v4 }
  0xd5   : > { %1620 = vmatpush3.bf16.msra.mxu0 %v1589_v36 }
  0xd6   : > { %v779_v11 = vsub.f32 %v777_v4, %v778_v7 }
  0xd8   : > { %1535 = vmatmul.mubr.f32.vlgmr.msra.gmra.mrb[0].mxu0 %v1747_v8  ;;  %v797_v8 = vsub.f32 %v694_v63, %v796_v5  ;;  %v780_v18 = vand.u32 4294901760, %v779_v11 }
  0xda   : > { %v798_v12 = vand.u32 4294901760, %v797_v8 }
  0xdc   : > { %v799_v19 = vsub.f32 %v797_v8, %v798_v12 }
  0xde   : > { %v800_v22 = vand.u32 4294901760, %v799_v19 }
 0x1ab   : > { %v674_v10 = vpop.f32.mrb[0].mxu0 }
 0x1ac   : > { %v678_v13 = vmax.f32 %v674_v10, 0.0  ;;  %v1536_v14 = vpop.f32.mrb[1].mxu0 }
 0x1ae   : > { %v698_v16 = vsel %vm696_vm3, %v678_v13, 0 }
 0x1af   : > { %v701_v17 = vand.u32 4294901760, %v698_v16 }
 0x1b1   : > { %v808_v21 = vsub.f32 %v698_v16, %v701_v17  ;;  %1537 = vmatprep.subr.mxu1 %v701_v17 }
 0x1b2   : > { %1538 = vmatpush3.msra.mxu1 %v701_v17 }
 0x1b3   : > { %1540 = vmatmul.mubr.f32.vlgmr.msra.gmra.mrb[0].mxu1 %v780_v18  ;;  %v809_v23 = vand.u32 4294901760, %v808_v21 }
 0x1b4   : > { %1542 = vmatprep.mubr.f32.mxu1 %v790_v20 }
 0x1b5   : > { %v810_v24 = vsub.f32 %v808_v21, %v809_v23 }
 0x1b7   : > { %1543 = vmatmul.mubr.f32.gmra.mrb[2].mxu1 %v800_v22  ;;  %v811_v25 = vand.u32 4294901760, %v810_v24 }
 0x1b8   : > { %1547 = vmatprep.mubr.f32.mxu1 %v1777_v51 }
 0x1b9   : > { %1545 = vmatprep.subr.mxu1 %v811_v25 }
 0x1ba   : > { %1546 = vmatpush3.msra.mxu1 %v811_v25 }
 0x1bb   : > { %1548 = vmatmul.mubr.f32.vlgmr.msra.gmra.mrb[0].mxu1 %v776_v61  ;;  %1553 = vmatprep.subr.mxu1 %v808_v21 }
 0x1bc   : > { %1554 = vmatpush3.msra.mxu1 %v808_v21  ;;  %1550 = vmatprep.mubr.f32.mxu1 %v786_v62 }
 0x1bd   : > { %1561 = vmatprep.subr.mxu1 %v701_v17 }
 0x1bf   : > { %1551 = vmatmul.mubr.f32.gmra.mrb[2].mxu1 %v796_v5 }
 0x1c0   : > { %1555 = vmatprep.mubr.f32.mxu1 %v767_v52 }
 0x1c3   : > { %1556 = vmatmul.mubr.f32.vlgmr.msra.gmra.mrb[0].mxu1 %v777_v4 }
 0x1c4   : > { %1562 = vmatpush3.msra.mxu1 %v701_v17  ;;  %1558 = vmatprep.mubr.f32.mxu1 %v787_v6 }
 0x1c5   : > { %1569 = vmatprep.subr.mxu1 %v809_v23 }
 0x1c7   : > { %1559 = vmatmul.mubr.f32.gmra.mrb[2].mxu1 %v797_v8 }
 0x1c8   : > { %1563 = vmatprep.mubr.f32.mxu1 %v768_v53 }
 0x1cb   : > { %1564 = vmatmul.mubr.f32.vlgmr.msra.gmra.mrb[0].mxu1 %v778_v7 }
 0x1cc   : > { %1570 = vmatpush3.msra.mxu1 %v809_v23  ;;  %1566 = vmatprep.mubr.f32.mxu1 %v788_v9 }
 0x1cd   : > { %1577 = vmatprep.subr.mxu1 %v701_v17 }
 0x1cf   : > { %1567 = vmatmul.mubr.f32.gmra.mrb[2].mxu1 %v798_v12 }
 0x1d0   : > { %1571 = vmatprep.mubr.f32.mxu1 %v1777_v51 }
 0x1d3   : > { %1572 = vmatmul.mubr.f32.vlgmr.msra.gmra.mrb[0].mxu1 %v776_v61 }
 0x1d4   : > { %1578 = vmatpush3.msra.mxu1 %v701_v17  ;;  %1574 = vmatprep.mubr.f32.mxu1 %v786_v62 }
 0x1d7   : > { %1575 = vmatmul.mubr.f32.gmra.mrb[2].mxu1 %v796_v5 }
 0x1d8   : > { %1579 = vmatprep.mubr.f32.mxu1 %v1777_v51 }
 0x1db   : > { %1580 = vmatmul.mubr.f32.vlgmr.msra.gmra.mrb[0].mxu1 %v776_v61 }
 0x1dc   : > { %1582 = vmatprep.mubr.f32.mxu1 %v786_v62 }
 0x1df   : > { %1583 = vmatmul.mubr.f32.gmra.mrb[2].mxu1 %v796_v5 }
 0x2ae   : > { %v1581_v27 = vpop.f32.mrb[0].mxu1 }
 0x2af   : > { %v1276_v28 = vand.u32 2147483647, %v1581_v27  ;;  %v1253_v29 = vpop.f32.mrb[1].mxu1  ;;  %vm1292_vm4 = vcmp.ge.f32.partialorder %v1581_v27, 0.0 }
 0x2b0   : > { %v1275_v30 = vand.u32 2147483647, %v1253_v29  ;;  %vm1291_vm5 = vcmp.ge.f32.partialorder %v1253_v29, 0.0 }
 0x2b1   : > { %v1280_v31 = vsub.f32 0.0, %v1276_v28 }
 0x2b2   : > { %v1279_v32 = vsub.f32 0.0, %v1275_v30  ;;  %v1584_v33 = vpop.f32.mrb[2].mxu1 }
 0x2b3   : > { %v1285_v34 = vmul.f32 1.442695, %v1280_v31  ;;  %v1278_v35 = vand.u32 2147483647, %v1584_v33  ;;  %v1265_v36 = vpop.f32.mrb[3].mxu1  ;;  %vm1294_vm7 = vcmp.ge.f32.partialorder %v1584_v33, 0.0 }
 0x2b4   : > { %v1283_v37 = vmul.f32 1.442695, %v1279_v32  ;;  %v1277_v38 = vand.u32 2147483647, %v1265_v36  ;;  %vm1293_vm6 = vcmp.ge.f32.partialorder %v1265_v36, 0.0 }
 0x2b5   : > { %1665 = vpow2.f32 %v1285_v34  ;;  %v1282_v39 = vsub.f32 0.0, %v1278_v35 }
 0x2b6   : > { %1667 = vpow2.f32 %v1283_v37  ;;  %v1281_v40 = vsub.f32 0.0, %v1277_v38 }
 0x2b7   : > { %v1289_v41 = vmul.f32 1.442695, %v1282_v39 }
 0x2b8   : > { %v1287_v42 = vmul.f32 1.442695, %v1281_v40 }
 0x2b9   : > { %1669 = vpow2.f32 %v1289_v41 }
 0x2ba   : > { %1671 = vpow2.f32 %v1287_v42 }
 0x2bf   : > { %v1666_v43 = vpop.eup %1665 }
 0x2c0   : > { %v1668_v44 = vpop.eup %1667  ;;  %v1296_v45 = vadd.f32 1.0, %v1666_v43 }
 0x2c1   : > { %v1295_v46 = vadd.f32 1.0, %v1668_v44 }
 0x2c2   : > { %1673 = vrcp.f32 %v1296_v45 }
 0x2c3   : > { %v1670_v47 = vpop.eup %1669  ;;  %1675 = vrcp.f32 %v1295_v46 }
 0x2c4   : > { %v1672_v48 = vpop.eup %1671  ;;  %v1298_v49 = vadd.f32 1.0, %v1670_v47 }
 0x2c5   : > { %v1297_v50 = vadd.f32 1.0, %v1672_v48 }
 0x2c6   : > { %1677 = vrcp.f32 %v1298_v49 }
 0x2c7   : > { %1679 = vrcp.f32 %v1297_v50 }
 0x2cc   : > { %v1674_v51 = vpop.eup %1673 }
 0x2cd   : > { %v1676_v52 = vpop.eup %1675  ;;  %v1308_v53 = vmul.f32 %v1674_v51, %v1666_v43 }
 0x2ce   : > { %v1307_v54 = vmul.f32 %v1676_v52, %v1668_v44 }
 0x2cf   : > { %v1312_v55 = vsel %vm1292_vm4, %v1674_v51, %v1308_v53 }
 0x2d0   : > { %v1678_v56 = vpop.eup %1677  ;;  %1322 = vperm.xlu1 %1664, %v1312_v55   ;;  %v1311_v57 = vsel %vm1291_vm5, %v1676_v52, %v1307_v54 }
 0x2d1   : > { %v1680_v58 = vpop.eup %1679  ;;  %1317 = vperm.xlu0 %1663, %v1311_v57   ;;  %v1310_v61 = vmul.f32 %v1678_v56, %v1670_v47 }
 0x2d2   : > { %v1309_v59 = vmul.f32 %v1680_v58, %v1672_v48 }
 0x2d3   : > { %v1314_v62 = vsel %vm1294_vm7, %v1678_v56, %v1310_v61 }
 0x2d4   : > { %v1313_v60 = vsel %vm1293_vm6, %v1680_v58, %v1309_v59 }
 0x2d5   : > { %1327 = vperm.xlu1 %1664, %v1313_v60  }
 0x2d9   : > { %1332 = vperm.xlu1 %1664, %v1314_v62  }
 0x34f   : > { %v1323_v63 = vpop.permute.xlu1 %1322 }
 0x350   : > { %v1336_v4 = vmul.f32 %v1323_v63, %v1737_v3  ;;  %v1318_v5 = vpop.permute.xlu0 %1317 }
 0x351   : > { %v1335_v6 = vmul.f32 %v1318_v5, %v1731_v1 }
 0x352   : > { %1340 = vst [vmem:[%s170_s30 + $0x8] sm:$0xff] %v1336_v4 }
 0x353   : > { %1339 = vst [vmem:[%s170_s30] sm:$0xff] %v1335_v6 }
 0x354   : > { %v1328_v7 = vpop.permute.xlu1 %1327 }
 0x355   : > { %v1337_v8 = vmul.f32 %v1328_v7, %v1729_v0 }
 0x357   : > { %1341 = vst [vmem:[%s170_s30 + $0x10] sm:$0xff] %v1337_v8 }
 0x358   : > { %v1333_v9 = vpop.permute.xlu1 %1332 }
 0x359   : > { %v1338_v10 = vmul.f32 %v1333_v9, %v1735_v2 }
 0x35b   : > { %1342 = vst [vmem:[%s170_s30 + $0x18] sm:$0xff] %v1338_v10 }
 0x35c PF: > { %s13_s12 = sadd.s32 1, %s1687_s12  }
 0x35d   : > { %p10_p4 = scmp.ge.s32.totalorder %s13_s12, 4  }
 0x35f   :  { %12 = sbr.rel (!%p10_p4) target bundleno = 1 (0x1), region = 62 }

</bundles_post_ra>
